<compile_context>
chip_gen: v7x
topology: tpu7x:2x2x1
jax: 0.10.0
libtpu: 0.0.40
codegen_flags: <defaults>
</compile_context>

<pallas_src>
import functools

import jax
import jax.numpy as jnp
from jax.experimental import pallas as pl
from jax.experimental.pallas import tpu as pltpu

_LANE = 128
_HEAD_ROWS = 8  # fused head output rows (row 0 = mean, row 1 = std, rest padding)


def _round_up(n, m):
    return ((n + m - 1) // m) * m


# ---------------------------------------------------------------------------
# Kernel (transposed layout: batch lives on the lane axis)
# ---------------------------------------------------------------------------
def _policy_kernel(xt_ref, w1t_ref, w2t_ref, wht_ref, b_ref, out_ref, *, action_bound):
    """One batch tile, batch along lanes.

    xt_ref : [in_dim, tb]   (f32 or bf16)   x^T tile, batch along lanes
    w1t_ref: [Hp, in_dim]   (f32 or bf16)   fc1 weight, transposed
    w2t_ref: [Hp, Hp]       (f32 or bf16)   fc2 weight, transposed
    wht_ref: [8, Hp]        (f32 or bf16)   fused head weight (row 0 mean, row 1 std)
    b_ref  : [Hp, 8]        (f32)           col 0 = b1, col 1 = b2, col 2 rows 0/1 = bm/bs
    out_ref: [8, tb]        (f32)           row 0 = mean, row 1 = std
    """
    mat_dtype = w1t_ref.dtype

    b = b_ref[...]                      # [Hp, 8] f32
    b1 = b[:, 0:1]                      # [Hp, 1]
    b2 = b[:, 1:2]                      # [Hp, 1]
    bh = b[0:_HEAD_ROWS, 2:3]           # [8, 1]

    # fc1 + relu   (MXU f32 accumulation; bias/relu in f32 on the VPU)
    h1 = jnp.dot(w1t_ref[...], xt_ref[...], preferred_element_type=jnp.float32)
    h1 = jnp.maximum(h1 + b1, 0.0)      # [Hp, tb]

    # fc2 + relu
    h2 = jnp.dot(w2t_ref[...], h1.astype(mat_dtype), preferred_element_type=jnp.float32)
    h2 = jnp.maximum(h2 + b2, 0.0)      # [Hp, tb]

    # fused heads: one matmul produces both the mean and std rows
    heads = jnp.dot(wht_ref[...], h2.astype(mat_dtype), preferred_element_type=jnp.float32)
    heads = heads + bh                  # [8, tb]

    row = jax.lax.broadcasted_iota(jnp.int32, heads.shape, 0)
    mean_val = jax.nn.sigmoid(heads) * action_bound            # EUP
    std_val = jnp.exp(jnp.clip(heads, -20.0, 2.0))              # EUP
    out_ref[...] = jnp.where(row == 0, mean_val, std_val).astype(out_ref.dtype)


# ---------------------------------------------------------------------------
# Parameter init (matches the PyTorch module) and packing for the kernel
# ---------------------------------------------------------------------------
def _xavier_uniform(key, fan_in, fan_out):
    # nn.init.xavier_uniform_ : U(-a, a), a = sqrt(6 / (fan_in + fan_out)).
    # Stored as [fan_in, fan_out] (transposed relative to torch's [out, in]).
    bound = jnp.sqrt(6.0 / (fan_in + fan_out))
    return jax.random.uniform(key, (fan_in, fan_out), jnp.float32, -bound, bound)


def init_policy_params(key, input_dim, hidden_dim=64):
    k1, k2, k3, k4 = jax.random.split(key, 4)
    return {
        "w1": _xavier_uniform(k1, input_dim, hidden_dim),
        "b1": jnp.zeros((hidden_dim,), jnp.float32),
        "w2": _xavier_uniform(k2, hidden_dim, hidden_dim),
        "b2": jnp.zeros((hidden_dim,), jnp.float32),
        "wm": _xavier_uniform(k3, hidden_dim, 1),
        "bm": jnp.zeros((1,), jnp.float32),
        "ws": _xavier_uniform(k4, hidden_dim, 1),
        "bs": jnp.zeros((1,), jnp.float32),
    }


def pack_policy_params(params, use_bf16=True):
    """Transpose weights for batch-in-lanes compute, zero-pad hidden to a multiple of
    128, fuse mean/std heads into one [8, Hp] weight, pack biases into one [Hp, 8]."""
    w1, b1 = params["w1"], params["b1"]
    w2, b2 = params["w2"], params["b2"]
    wm, bm = params["wm"], params["bm"]
    ws, bs = params["ws"], params["bs"]

    in_dim, hidden = w1.shape
    hp = _round_up(hidden, _LANE)       # padded hidden width (>= 128)

    w1t = jnp.zeros((hp, in_dim), jnp.float32).at[:hidden, :].set(w1.T)
    w2t = jnp.zeros((hp, hp), jnp.float32).at[:hidden, :hidden].set(w2.T)
    wht = (jnp.zeros((_HEAD_ROWS, hp), jnp.float32)
           .at[0, :hidden].set(wm[:, 0])
           .at[1, :hidden].set(ws[:, 0]))

    b = (jnp.zeros((hp, 8), jnp.float32)
         .at[:hidden, 0].set(b1)
         .at[:hidden, 1].set(b2)
         .at[0, 2].set(bm[0])
         .at[1, 2].set(bs[0]))

    mat_dtype = jnp.bfloat16 if use_bf16 else jnp.float32
    return {
        "w1t": w1t.astype(mat_dtype),
        "w2t": w2t.astype(mat_dtype),
        "wht": wht.astype(mat_dtype),
        "b": b,  # biases stay f32 (added after the f32-accumulated matmul)
    }


# ---------------------------------------------------------------------------
# Forward wrapper
# ---------------------------------------------------------------------------
def policy_network_forward(x, packed, action_bound=1.0, block_b=2048):
    """x: [B, input_dim] f32. Returns (action_mean [B,1], action_std [B,1])."""
    B, in_dim = x.shape
    hp = packed["w1t"].shape[0]
    mat_dtype = packed["w1t"].dtype

    # Lane-dense batch padding and tile selection.  Large batches are capped so the
    # grid has >= 2 steps (both v7x TensorCores engage); small batches run as one block.
    bp = _round_up(B, _LANE)
    if bp <= _LANE:
        tb = _LANE
    else:
        tb = min(_round_up(block_b, _LANE), _round_up(pl.cdiv(bp, 2), _LANE))
    bp = _round_up(bp, tb)

    # Transpose + pad + (optional) bf16 cast of x in the wrapper, not per-tile in-kernel.
    xt = jnp.zeros((in_dim, bp), mat_dtype).at[:, :B].set(x.T.astype(mat_dtype))

    kernel = functools.partial(_policy_kernel, action_bound=float(action_bound))

    itemsize = jnp.dtype(mat_dtype).itemsize
    flops = 2 * bp * (in_dim * hp + hp * hp + hp * _HEAD_ROWS)
    transcendentals = 2 * _HEAD_ROWS * bp
    bytes_accessed = (in_dim * bp * itemsize                     # x^T
                      + (hp * in_dim + hp * hp + _HEAD_ROWS * hp) * itemsize
                      + hp * 8 * 4                               # biases (f32)
                      + _HEAD_ROWS * bp * 4)                     # output (f32)

    out = pl.pallas_call(
        kernel,
        out_shape=jax.ShapeDtypeStruct((_HEAD_ROWS, bp), jnp.float32),
        grid_spec=pltpu.PrefetchScalarGridSpec(
            num_scalar_prefetch=0,
            grid=(bp // tb,),
            in_specs=[
                pl.BlockSpec((in_dim, tb), lambda i: (0, i)),        # x^T tile (pipelined)
                pl.BlockSpec((hp, in_dim), lambda i: (0, 0)),        # weights resident
                pl.BlockSpec((hp, hp), lambda i: (0, 0)),
                pl.BlockSpec((_HEAD_ROWS, hp), lambda i: (0, 0)),
                pl.BlockSpec((hp, 8), lambda i: (0, 0)),             # fused biases
            ],
            out_specs=pl.BlockSpec((_HEAD_ROWS, tb), lambda i: (0, i)),
        ),
        compiler_params=pltpu.CompilerParams(
            dimension_semantics=("parallel",)),
        cost_estimate=pl.CostEstimate(
            flops=flops,
            transcendentals=transcendentals,
            bytes_accessed=bytes_accessed),
    )(xt, packed["w1t"], packed["w2t"], packed["wht"], packed["b"])

    action_mean = out[0, :B].reshape(B, 1)
    action_std = out[1, :B].reshape(B, 1)
    return action_mean, action_std


# ---------------------------------------------------------------------------
# Pure-JAX reference (mirrors the PyTorch forward)
# ---------------------------------------------------------------------------
def _reference_forward(x, params, action_bound=1.0):
    h1 = jnp.maximum(x @ params["w1"] + params["b1"], 0.0)
    h2 = jnp.maximum(h1 @ params["w2"] + params["b2"], 0.0)
    mean = jax.nn.sigmoid(h2 @ params["wm"] + params["bm"]) * action_bound
    std = jnp.exp(jnp.clip(h2 @ params["ws"] + params["bs"], -20.0, 2.0))
    return mean, std


if __name__ == "__main__":
    key = jax.random.PRNGKey(0)
    k_params, k_x, kb1, kb2, kbm, kbs, k_xl = jax.random.split(key, 7)

    batch, input_dim, hidden_dim = 8, 8, 64
    action_bound = 2.0

    params = init_policy_params(k_params, input_dim, hidden_dim)
    # The module zero-initializes biases; perturb them so bias handling is exercised.
    params["b1"] = 0.1 * jax.random.normal(kb1, (hidden_dim,), jnp.float32)
    params["b2"] = 0.1 * jax.random.normal(kb2, (hidden_dim,), jnp.float32)
    params["bm"] = 0.1 * jax.random.normal(kbm, (1,), jnp.float32)
    params["bs"] = 0.1 * jax.random.normal(kbs, (1,), jnp.float32)

    x = jax.random.normal(k_x, (batch, input_dim), jnp.float32)
    ref_mean, ref_std = _reference_forward(x, params, action_bound)

    # --- f32 matmul path: strict check (single-block grid) ------------------
    packed_f32 = pack_policy_params(params, use_bf16=False)
    mean, std = policy_network_forward(x, packed_f32, action_bound)
    jax.block_until_ready((mean, std))
    assert mean.shape == (batch, 1) and std.shape == (batch, 1)
    assert jnp.allclose(mean, ref_mean, atol=1e-4, rtol=1e-4)
    assert jnp.allclose(std, ref_std, atol=1e-4, rtol=1e-4)

    # --- bf16 matmul path (v6e/v7x MXU-friendly): loose check ----------------
    packed_bf16 = pack_policy_params(params, use_bf16=True)
    mean_b, std_b = policy_network_forward(x, packed_bf16, action_bound)
    jax.block_until_ready((mean_b, std_b))
    assert jnp.allclose(mean_b, ref_mean, atol=5e-2, rtol=5e-2)
    assert jnp.allclose(std_b, ref_std, atol=5e-2, rtol=5e-2)

    # --- larger batch: exercises padding + a multi-step (2-core) grid --------
    x_large = jax.random.normal(k_xl, (200, input_dim), jnp.float32)
    ref_mean_l, ref_std_l = _reference_forward(x_large, params, action_bound)
    mean_l, std_l = policy_network_forward(x_large, packed_f32, action_bound)
    jax.block_until_ready((mean_l, std_l))
    assert mean_l.shape == (200, 1) and std_l.shape == (200, 1)
    assert jnp.allclose(mean_l, ref_mean_l, atol=1e-4, rtol=1e-4)
    assert jnp.allclose(std_l, ref_std_l, atol=1e-4, rtol=1e-4)

    print("KERNEL_OK")
</pallas_src>

<mosaic_0001>
module attributes {stable_mosaic.version = 11 : i64} {
  func.func @_policy_kernel(%arg0: i32, %arg1: memref<8x128xf32, #tpu.memory_space<vmem>>, %arg2: memref<128x8xf32, #tpu.memory_space<vmem>>, %arg3: memref<128x128xf32, #tpu.memory_space<vmem>>, %arg4: memref<8x128xf32, #tpu.memory_space<vmem>>, %arg5: memref<128x8xf32, #tpu.memory_space<vmem>>, %arg6: memref<8x128xf32, #tpu.memory_space<vmem>>) attributes {dimension_semantics = [#tpu.dimension_semantics<parallel>], iteration_bounds = array<i64: 1>, scalar_prefetch = 0 : i64, scratch_operands = 0 : i64, tpu.core_type = #tpu.core_type<tc>, window_params = [{transform_indices = @transform_0, window_bounds = array<i64: 8, 128>}, {pipeline_mode = #tpu.pipeline_mode<synchronous>, transform_indices = @transform_1, window_bounds = array<i64: 128, 8>}, {pipeline_mode = #tpu.pipeline_mode<synchronous>, transform_indices = @transform_2, window_bounds = array<i64: 128, 128>}, {pipeline_mode = #tpu.pipeline_mode<synchronous>, transform_indices = @transform_3, window_bounds = array<i64: 8, 128>}, {pipeline_mode = #tpu.pipeline_mode<synchronous>, transform_indices = @transform_4, window_bounds = array<i64: 128, 8>}, {transform_indices = @transform_5, window_bounds = array<i64: 8, 128>}]} {
    %c0 = arith.constant 0 : index
    %c0_0 = arith.constant 0 : index
    %0 = vector.load %arg5[%c0, %c0_0] : memref<128x8xf32, #tpu.memory_space<vmem>>, vector<128x8xf32>
    %1 = vector.extract_strided_slice %0 {offsets = [0, 0], sizes = [128, 1], strides = [1, 1]} : vector<128x8xf32> to vector<128x1xf32>
    %2 = vector.extract_strided_slice %0 {offsets = [0, 1], sizes = [128, 1], strides = [1, 1]} : vector<128x8xf32> to vector<128x1xf32>
    %3 = vector.extract_strided_slice %0 {offsets = [0, 2], sizes = [8, 1], strides = [1, 1]} : vector<128x8xf32> to vector<8x1xf32>
    %c0_1 = arith.constant 0 : index
    %c0_2 = arith.constant 0 : index
    %4 = vector.load %arg2[%c0_1, %c0_2] : memref<128x8xf32, #tpu.memory_space<vmem>>, vector<128x8xf32>
    %c0_3 = arith.constant 0 : index
    %c0_4 = arith.constant 0 : index
    %5 = vector.load %arg1[%c0_3, %c0_4] : memref<8x128xf32, #tpu.memory_space<vmem>>, vector<8x128xf32>
    %cst = arith.constant dense<0.000000e+00> : vector<128x128xf32>
    %6 = tpu.matmul %4, %5, %cst {dimension_numbers = #tpu.dot_dimension_numbers<[1], [0], [0], [1], [0, 0, 1, 1], [], []>} : vector<128x8xf32>, vector<8x128xf32>, vector<128x128xf32> -> vector<128x128xf32>
    %7 = vector.broadcast %1 : vector<128x1xf32> to vector<128x128xf32>
    %8 = arith.addf %6, %7 : vector<128x128xf32>
    %cst_5 = arith.constant 0.000000e+00 : f32
    %9 = vector.broadcast %cst_5 : f32 to vector<128x128xf32>
    %10 = arith.maximumf %8, %9 : vector<128x128xf32>
    %c0_6 = arith.constant 0 : index
    %c0_7 = arith.constant 0 : index
    %11 = vector.load %arg3[%c0_6, %c0_7] : memref<128x128xf32, #tpu.memory_space<vmem>>, vector<128x128xf32>
    %cst_8 = arith.constant dense<0.000000e+00> : vector<128x128xf32>
    %12 = tpu.matmul %11, %10, %cst_8 {dimension_numbers = #tpu.dot_dimension_numbers<[1], [0], [0], [1], [0, 0, 1, 1], [], []>} : vector<128x128xf32>, vector<128x128xf32>, vector<128x128xf32> -> vector<128x128xf32>
    %13 = vector.broadcast %2 : vector<128x1xf32> to vector<128x128xf32>
    %14 = arith.addf %12, %13 : vector<128x128xf32>
    %cst_9 = arith.constant 0.000000e+00 : f32
    %15 = vector.broadcast %cst_9 : f32 to vector<128x128xf32>
    %16 = arith.maximumf %14, %15 : vector<128x128xf32>
    %c0_10 = arith.constant 0 : index
    %c0_11 = arith.constant 0 : index
    %17 = vector.load %arg4[%c0_10, %c0_11] : memref<8x128xf32, #tpu.memory_space<vmem>>, vector<8x128xf32>
    %cst_12 = arith.constant dense<0.000000e+00> : vector<8x128xf32>
    %18 = tpu.matmul %17, %16, %cst_12 {dimension_numbers = #tpu.dot_dimension_numbers<[1], [0], [0], [1], [0, 0, 1, 1], [], []>} : vector<8x128xf32>, vector<128x128xf32>, vector<8x128xf32> -> vector<8x128xf32>
    %19 = vector.broadcast %3 : vector<8x1xf32> to vector<8x128xf32>
    %20 = arith.addf %18, %19 : vector<8x128xf32>
    %21 = tpu.iota {dimensions = array<i32: 0>} : vector<8x128xi32>
    %22 = arith.negf %20 : vector<8x128xf32>
    %23 = math.exp %22 : vector<8x128xf32>
    %cst_13 = arith.constant 1.000000e+00 : f32
    %24 = vector.broadcast %cst_13 : f32 to vector<8x128xf32>
    %25 = arith.addf %24, %23 : vector<8x128xf32>
    %26 = arith.divf %24, %25 : vector<8x128xf32>
    %cst_14 = arith.constant 2.000000e+00 : f32
    %27 = vector.broadcast %cst_14 : f32 to vector<8x128xf32>
    %28 = arith.mulf %26, %27 : vector<8x128xf32>
    %cst_15 = arith.constant -2.000000e+01 : f32
    %cst_16 = arith.constant 2.000000e+00 : f32
    %29 = vector.broadcast %cst_15 : f32 to vector<8x128xf32>
    %30 = arith.maximumf %29, %20 : vector<8x128xf32>
    %31 = vector.broadcast %cst_16 : f32 to vector<8x128xf32>
    %32 = arith.minimumf %31, %30 : vector<8x128xf32>
    %33 = math.exp %32 : vector<8x128xf32>
    %c0_i32 = arith.constant 0 : i32
    %34 = vector.broadcast %c0_i32 : i32 to vector<8x128xi32>
    %35 = arith.cmpi eq, %21, %34 : vector<8x128xi32>
    %36 = arith.select %35, %28, %33 : vector<8x128xi1>, vector<8x128xf32>
    %c0_17 = arith.constant 0 : index
    %c0_18 = arith.constant 0 : index
    %37 = vector.load %arg6[%c0_17, %c0_18] : memref<8x128xf32, #tpu.memory_space<vmem>>, vector<8x128xf32>
    tpu.vector_store %arg6[%c0_17, %c0_18], %36 {strides = array<i32>} : memref<8x128xf32, #tpu.memory_space<vmem>>, vector<8x128xf32>,
    return
  }
  func.func @transform_0(%arg0: i32) -> (i32, i32) {
    %c0_i32 = arith.constant 0 : i32
    %c0_i32_0 = arith.constant 0 : i32
    return %c0_i32, %arg0 : i32, i32
  }
  func.func @transform_1(%arg0: i32) -> (i32, i32) {
    %c0_i32 = arith.constant 0 : i32
    %c0_i32_0 = arith.constant 0 : i32
    %c0_i32_1 = arith.constant 0 : i32
    return %c0_i32, %c0_i32_0 : i32, i32
  }
  func.func @transform_2(%arg0: i32) -> (i32, i32) {
    %c0_i32 = arith.constant 0 : i32
    %c0_i32_0 = arith.constant 0 : i32
    %c0_i32_1 = arith.constant 0 : i32
    return %c0_i32, %c0_i32_0 : i32, i32
  }
  func.func @transform_3(%arg0: i32) -> (i32, i32) {
    %c0_i32 = arith.constant 0 : i32
    %c0_i32_0 = arith.constant 0 : i32
    %c0_i32_1 = arith.constant 0 : i32
    return %c0_i32, %c0_i32_0 : i32, i32
  }
  func.func @transform_4(%arg0: i32) -> (i32, i32) {
    %c0_i32 = arith.constant 0 : i32
    %c0_i32_0 = arith.constant 0 : i32
    %c0_i32_1 = arith.constant 0 : i32
    return %c0_i32, %c0_i32_0 : i32, i32
  }
  func.func @transform_5(%arg0: i32) -> (i32, i32) {
    %c0_i32 = arith.constant 0 : i32
    %c0_i32_0 = arith.constant 0 : i32
    return %c0_i32, %arg0 : i32, i32
  }
}

</mosaic_0001>

<bundles_post_ra>
// kernel: tpu_custom_call.1
= control target key start
LH: loop header
LB: loop body
LE: loop exit
PB: predicated region body
PF: predicated region fallthrough
CT: control target
= control target key end

     0   :  { %vm134_vm0 = vcmask 64512   ;;  %v989_v4 = vmov 0   ;;  %s1217_s0 = inlined_call_operand.vmem [shape: f32[8,128], index: 0, kind: input, shape index: {}]   ;;  %s1218_s1 = inlined_call_operand.vmem [shape: f32[128,8], index: 1, kind: input, shape index: {}]   ;;  %s1219_s2 = inlined_call_operand.vmem [shape: f32[128,128], index: 2, kind: input, shape index: {}]   ;;  %s1220_s3 = inlined_call_operand.vmem [shape: f32[8,128], index: 3, kind: input, shape index: {}]   ;;  %s1221_s4 = inlined_call_operand.vmem [shape: f32[128,8], index: 4, kind: input, shape index: {}]   ;;  %s1222_s5 = inlined_call_operand.hbm [shape: f32[8,128], index: 5, kind: output, shape index: {}]  }
   0x1   :  { %v53_v0 = vld [vmem:[%s1217_s0] sm:$0xff]  ;;  %v38_v2 = vld [vmem:[%s1218_s1 + $0x8] sm:$0xff]  ;;  %v39_v3 = vld [vmem:[%s1218_s1 + $0x10] sm:$0xff]  ;;  %953 = vset.pattern.permute.xlu0 %v989_v4  ;;  %954 = vset.pattern.permute.xlu1 %v989_v4 }
   0x2   :  { %v37_v1 = vld [vmem:[%s1218_s1] sm:$0xff]  ;;  %773 = vmatprep.subr.mxu0 %v53_v0  ;;  %v40_v5 = vld [vmem:[%s1218_s1 + $0x18] sm:$0xff]  ;;  %v23_v8 = vld [vmem:[%s1221_s4 + $0x10] sm:$0xff] }
   0x3   :  { %775 = vmatprep.mubr.msk.f32.mxu0 %vm134_vm0, %v37_v1  ;;  %774 = vmatpush3.msra.mxu0 %v53_v0  ;;  %v41_v6 = vld [vmem:[%s1218_s1 + $0x20] sm:$0xff]  ;;  %v22_v9 = vld [vmem:[%s1221_s4 + $0x8] sm:$0xff]  ;;  %v24_v11 = vld [vmem:[%s1221_s4 + $0x18] sm:$0xff] }
   0x4   :  { %776 = vmatmul.mubr.msk.f32.vlgmr.msra.gmra.mrb[0].mxu0 %vm134_vm0, %v38_v2  ;;  %v1050_v7 = vld [vmem:[%s1221_s4] sm:$0xff]  ;;  %66 = vperm.xlu1 %954, %v23_v8   ;;  %v42_v10 = vld [vmem:[%s1218_s1 + $0x28] sm:$0xff]  ;;  %v43_v12 = vld [vmem:[%s1218_s1 + $0x30] sm:$0xff] }
   0x5   :  { %778 = vmatprep.mubr.msk.f32.mxu0 %vm134_vm0, %v39_v3  ;;  %56 = vperm.xlu0 %953, %v1050_v7   ;;  %v25_v13 = vld [vmem:[%s1221_s4 + $0x20] sm:$0xff] }
   0x8   :  { %779 = vmatmul.mubr.msk.f32.gmra.mrb[2].mxu0 %vm134_vm0, %v40_v5  ;;  %71 = vperm.xlu1 %954, %v24_v11  }
   0x9   :  { %781 = vmatprep.mubr.msk.f32.mxu0 %vm134_vm0, %v41_v6  ;;  %61 = vperm.xlu0 %953, %v22_v9  }
   0xc   :  { %782 = vmatmul.mubr.msk.f32.gmra.mrb[4].mxu0 %vm134_vm0, %v42_v10 }
   0xd   :  { %10 = vsyncpa [#allocation3], 0  ;;  %784 = vmatprep.mubr.msk.f32.mxu0 %vm134_vm0, %v43_v12  ;;  %v44_v14 = vld [vmem:[%s1218_s1 + $0x38] sm:$0xff]  ;;  %v26_v15 = vld [vmem:[%s1221_s4 + $0x28] sm:$0xff]  ;;  %76 = vperm.xlu0 %953, %v25_v13   ;;  %v990_v35 = vmov 1   ;;  %vm992_vm1 = vmmov 0  }
   0xe   :  { %v45_v16 = vld [vmem:[%s1218_s1 + $0x40] sm:$0xff]  ;;  %81 = vperm.xlu1 %954, %v26_v15   ;;  %v27_v17 = vld [vmem:[%s1221_s4 + $0x30] sm:$0xff]  ;;  %v46_v18 = vld [vmem:[%s1218_s1 + $0x48] sm:$0xff]  ;;  %s995_s9 = smov [#allocation2]  }
   0xf   :  { %v28_v19 = vld [vmem:[%s1221_s4 + $0x38] sm:$0xff]  ;;  %v47_v20 = vld [vmem:[%s1218_s1 + $0x50] sm:$0xff]  ;;  %v29_v21 = vld [vmem:[%s1221_s4 + $0x40] sm:$0xff]  ;;  %s682_s10 = sshll.u32 %s995_s9, 4  ;;  %s683_s10 = int_to_ptr.vmem [resolvable:$true] %s682_s10 }
  0x10   :  { %785 = vmatmul.mubr.msk.f32.gmra.mrb[6].mxu0 %vm134_vm0, %v44_v14  ;;  %v48_v22 = vld [vmem:[%s1218_s1 + $0x58] sm:$0xff]  ;;  %v30_v23 = vld [vmem:[%s1221_s4 + $0x48] sm:$0xff]  ;;  %v49_v24 = vld [vmem:[%s1218_s1 + $0x60] sm:$0xff]  ;;  %p970_p1 = scmp.lt.s32.totalorder %s683_s10, %s683_s10 }
  0x11   :  { %787 = vmatprep.mubr.msk.f32.mxu0 %vm134_vm0, %v45_v16  ;;  %86 = vperm.xlu0 %953, %v27_v17   ;;  %v31_v25 = vld [vmem:[%s1221_s4 + $0x50] sm:$0xff]  ;;  %v50_v26 = vld [vmem:[%s1218_s1 + $0x68] sm:$0xff]  ;;  %v32_v27 = vld [vmem:[%s1221_s4 + $0x58] sm:$0xff] }
  0x12   :  { %91 = vperm.xlu1 %954, %v28_v19   ;;  %v51_v28 = vld [vmem:[%s1218_s1 + $0x70] sm:$0xff]  ;;  %v33_v29 = vld [vmem:[%s1221_s4 + $0x60] sm:$0xff]  ;;  %v52_v30 = vld [vmem:[%s1218_s1 + $0x78] sm:$0xff] }
  0x13   :  { %v34_v31 = vld [vmem:[%s1221_s4 + $0x68] sm:$0xff]  ;;  %v35_v32 = vld [vmem:[%s1221_s4 + $0x70] sm:$0xff]  ;;  %v36_v33 = vld [vmem:[%s1221_s4 + $0x78] sm:$0xff] }
  0x14   :  { %788 = vmatmul.mubr.msk.f32.gmra.mrb[8].mxu0 %vm134_vm0, %v46_v18  ;;  %v344_v34 = vld [vmem:[%s1219_s2] sm:$0xff] }
  0x15   :  { %790 = vmatprep.mubr.msk.f32.mxu0 %vm134_vm0, %v47_v20  ;;  %96 = vperm.xlu0 %953, %v29_v21  }
  0x16   :  { %101 = vperm.xlu1 %954, %v30_v23   ;;  %831 = vmatprep.mubr.f32.mxu1 %v344_v34 }
  0x18   :  { %791 = vmatmul.mubr.msk.f32.gmra.mrb[10].mxu0 %vm134_vm0, %v48_v22 }
  0x19   :  { %793 = vmatprep.mubr.msk.f32.mxu0 %vm134_vm0, %v49_v24  ;;  %106 = vperm.xlu0 %953, %v31_v25  }
  0x1a   :  { %111 = vperm.xlu1 %954, %v32_v27  }
  0x1c   :  { %794 = vmatmul.mubr.msk.f32.gmra.mrb[12].mxu0 %vm134_vm0, %v50_v26 }
  0x1d   :  { %796 = vmatprep.mubr.msk.f32.mxu0 %vm134_vm0, %v51_v28  ;;  %116 = vperm.xlu0 %953, %v33_v29  }
  0x1e   :  { %121 = vperm.xlu1 %954, %v34_v31  }
  0x20   :  { %797 = vmatmul.mubr.msk.f32.gmra.mrb[14].mxu0 %vm134_vm0, %v52_v30 }
  0x21   :  { %126 = vperm.xlu0 %953, %v35_v32  }
  0x22   :  { %131 = vperm.xlu1 %954, %v36_v33  }
  0x25   :  { %955 = vset.pattern.permute.xlu0 %v990_v35 }
  0x26   :  { %956 = vset.pattern.permute.xlu1 %v990_v35  ;;  %361 = vperm.xlu0 %955, %v1050_v7  }
  0x27   :  { %365 = vperm.xlu1 %956, %v22_v9  }
  0x2a   :  { %373 = vperm.xlu0 %955, %v24_v11  }
  0x2b   :  { %369 = vperm.xlu1 %956, %v23_v8  }
  0x2e   :  { %381 = vperm.xlu0 %955, %v26_v15  }
  0x2f   :  { %377 = vperm.xlu1 %956, %v25_v13  }
  0x32   :  { %389 = vperm.xlu0 %955, %v28_v19  }
  0x33   :  { %385 = vperm.xlu1 %956, %v27_v17  }
  0x36   :  { %397 = vperm.xlu0 %955, %v30_v23  }
  0x37   :  { %393 = vperm.xlu1 %956, %v29_v21  }
  0x3a   :  { %405 = vperm.xlu0 %955, %v32_v27  }
  0x3b   :  { %401 = vperm.xlu1 %956, %v31_v25  }
  0x3e   :  { %413 = vperm.xlu0 %955, %v34_v31  }
  0x3f   :  { %409 = vperm.xlu1 %956, %v33_v29  }
  0x42   :  { %421 = vperm.xlu0 %955, %v36_v33  }
  0x43   :  { %417 = vperm.xlu1 %956, %v35_v32  }
  0x83   :  { %v67_v36 = vpop.permute.xlu1 %66 }
  0x84   :  { %v57_v37 = vpop.permute.xlu0 %56 }
  0x87   :  { %v72_v38 = vpop.permute.xlu1 %71 }
  0x88   :  { %v62_v39 = vpop.permute.xlu0 %61 }
  0x8c   :  { %v77_v41 = vpop.permute.xlu0 %76 }
  0x8d   :  { %v82_v40 = vpop.permute.xlu1 %81 }
  0x90   :  { %v87_v50 = vpop.permute.xlu0 %86 }
  0x91   :  { %v92_v47 = vpop.permute.xlu1 %91 }
  0x94   :  { %v97_v63 = vpop.permute.xlu0 %96 }
  0x95   :  { %v102_v60 = vpop.permute.xlu1 %101 }
  0x98   :  { %v107_v12 = vpop.permute.xlu0 %106 }
  0x99   :  { %v112_v9 = vpop.permute.xlu1 %111 }
  0x9c   :  { %v117_v25 = vpop.permute.xlu0 %116 }
  0x9d   :  { %v122_v22 = vpop.permute.xlu1 %121 }
  0xa1   :  { %v132_v34 = vpop.permute.xlu1 %131 }
  0xd7   :  { %v777_v42 = vpop.f32.mrb[0].mxu0 }
  0xd8   :  { %v255_v43 = vadd.f32 %v777_v42, %v62_v39  ;;  %v249_v44 = vpop.f32.mrb[1].mxu0 }
  0xd9   :  { %v250_v45 = vadd.f32 %v249_v44, %v57_v37  ;;  %v127_v37 = vpop.permute.xlu0 %126 }
  0xda   :  { %v329_v46 = vmax.f32 %v255_v43, 0.0 }
  0xdb   :  { %v328_v48 = vmax.f32 %v250_v45, 0.0  ;;  %v780_v49 = vpop.f32.mrb[2].mxu0  ;;  %v345_v45 = vld [vmem:[%s1219_s2 + $0x8] sm:$0xff] }
  0xdc   :  { %v265_v51 = vadd.f32 %v780_v49, %v72_v38  ;;  %v259_v52 = vpop.f32.mrb[3].mxu0  ;;  %v349_v49 = vld [vmem:[%s1219_s2 + $0x28] sm:$0xff] }
  0xdd   :  { %v260_v53 = vadd.f32 %v259_v52, %v67_v36  ;;  %v890_v54 = vpack.c.bf16 %v329_v46, %v328_v48  ;;  %v346_v46 = vld [vmem:[%s1219_s2 + $0x10] sm:$0xff]  ;;  %v348_v48 = vld [vmem:[%s1219_s2 + $0x20] sm:$0xff] }
  0xde   :  { %v331_v55 = vmax.f32 %v265_v51, 0.0  ;;  %v351_v51 = vld [vmem:[%s1219_s2 + $0x38] sm:$0xff]  ;;  %v352_v52 = vld [vmem:[%s1219_s2 + $0x40] sm:$0xff] }
  0xdf   :  { %v330_v56 = vmax.f32 %v260_v53, 0.0  ;;  %v783_v57 = vpop.f32.mrb[4].mxu0  ;;  %891 = vmatprep.subr.bf16.mxu1 %v890_v54  ;;  %v353_v53 = vld [vmem:[%s1219_s2 + $0x48] sm:$0xff] }
  0xe0   :  { %v275_v58 = vadd.f32 %v783_v57, %v82_v40  ;;  %v269_v59 = vpop.f32.mrb[5].mxu0  ;;  %893 = vmatpush3.bf16.msra.mxu1 %v890_v54  ;;  %v354_v54 = vld [vmem:[%s1219_s2 + $0x50] sm:$0xff]  ;;  %v357_v57 = vld [vmem:[%s1219_s2 + $0x68] sm:$0xff] }
  0xe1   :  { %v894_v61 = vpack.c.bf16 %v331_v55, %v330_v56  ;;  %v270_v62 = vadd.f32 %v269_v59, %v77_v41  ;;  %v355_v55 = vld [vmem:[%s1219_s2 + $0x58] sm:$0xff]  ;;  %v356_v56 = vld [vmem:[%s1219_s2 + $0x60] sm:$0xff] }
  0xe2   :  { %v333_v0 = vmax.f32 %v275_v58, 0.0  ;;  %v358_v58 = vld [vmem:[%s1219_s2 + $0x70] sm:$0xff]  ;;  %v359_v59 = vld [vmem:[%s1219_s2 + $0x78] sm:$0xff] }
  0xe3   :  { %v332_v1 = vmax.f32 %v270_v62, 0.0  ;;  %v786_v2 = vpop.f32.mrb[6].mxu0  ;;  %895 = vmatprep.subr.bf16.mxu1 %v894_v61  ;;  %v994_v62 = vmov 2  }
  0xe4   :  { %v285_v3 = vadd.f32 %v786_v2, %v92_v47  ;;  %v279_v4 = vpop.f32.mrb[7].mxu0  ;;  %897 = vmatpush3.bf16.msra.mxu1 %v894_v61  ;;  %v347_v47 = vld [vmem:[%s1219_s2 + $0x18] sm:$0xff]  ;;  %v993_v61 = vmov 0.0   ;;  %957 = vset.pattern.permute.xlu1 %v994_v62 }
  0xe5   :  { %v898_v5 = vpack.c.bf16 %v333_v0, %v332_v1  ;;  %v280_v6 = vadd.f32 %v279_v4, %v87_v50  ;;  %v350_v50 = vld [vmem:[%s1219_s2 + $0x30] sm:$0xff]  ;;  %887 = vmatprep.mubr.msk.f32.mxu0 %vm992_vm1, %v993_v61  ;;  %958 = vset.pattern.permute.xlu0 %v994_v62  ;;  %v366_v0 = vpop.permute.xlu1 %365 }
  0xe6   :  { %v335_v8 = vmax.f32 %v285_v3, 0.0  ;;  %587 = vperm.xlu1 %957, %v1050_v7  }
  0xe7   :  { %v334_v10 = vmax.f32 %v280_v6, 0.0  ;;  %v789_v11 = vpop.f32.mrb[8].mxu0  ;;  %899 = vmatprep.subr.bf16.mxu1 %v898_v5 }
  0xe8   :  { %v295_v13 = vadd.f32 %v789_v11, %v102_v60  ;;  %v289_v14 = vpop.f32.mrb[9].mxu0  ;;  %901 = vmatpush3.bf16.msra.mxu1 %v898_v5  ;;  %v991_v60 = vmov 0.0|0.0  }
  0xe9   :  { %v902_v15 = vpack.c.bf16 %v335_v8, %v334_v10  ;;  %v290_v16 = vadd.f32 %v289_v14, %v97_v63  ;;  %922 = vmatprep.subr.bf16.mxu0 %v991_v60  ;;  %v362_v63 = vpop.permute.xlu0 %361  ;;  %v370_v2 = vpop.permute.xlu1 %369 }
  0xea   :  { %v337_v17 = vmax.f32 %v295_v13, 0.0 }
  0xeb   :  { %v336_v18 = vmax.f32 %v290_v16, 0.0  ;;  %v792_v19 = vpop.f32.mrb[10].mxu0  ;;  %903 = vmatprep.subr.bf16.mxu1 %v902_v15 }
  0xec   :  { %v305_v20 = vadd.f32 %v792_v19, %v112_v9  ;;  %v299_v21 = vpop.f32.mrb[11].mxu0  ;;  %905 = vmatpush3.bf16.msra.mxu1 %v902_v15 }
  0xed   :  { %v906_v23 = vpack.c.bf16 %v337_v17, %v336_v18  ;;  %v300_v24 = vadd.f32 %v299_v21, %v107_v12  ;;  %v374_v1 = vpop.permute.xlu0 %373  ;;  %v378_v4 = vpop.permute.xlu1 %377 }
  0xee   :  { %v339_v26 = vmax.f32 %v305_v20, 0.0 }
  0xef   :  { %v338_v27 = vmax.f32 %v300_v24, 0.0  ;;  %v795_v28 = vpop.f32.mrb[12].mxu0  ;;  %907 = vmatprep.subr.bf16.mxu1 %v906_v23 }
  0xf0   :  { %v315_v29 = vadd.f32 %v795_v28, %v122_v22  ;;  %v309_v30 = vpop.f32.mrb[13].mxu0  ;;  %909 = vmatpush3.bf16.msra.mxu1 %v906_v23 }
  0xf1   :  { %v910_v31 = vpack.c.bf16 %v339_v26, %v338_v27  ;;  %v310_v32 = vadd.f32 %v309_v30, %v117_v25  ;;  %v382_v3 = vpop.permute.xlu0 %381  ;;  %v386_v14 = vpop.permute.xlu1 %385 }
  0xf2   :  { %v341_v33 = vmax.f32 %v315_v29, 0.0 }
  0xf3   :  { %v340_v35 = vmax.f32 %v310_v32, 0.0  ;;  %v798_v36 = vpop.f32.mrb[14].mxu0  ;;  %911 = vmatprep.subr.bf16.mxu1 %v910_v31 }
  0xf4   :  { %v325_v38 = vadd.f32 %v798_v36, %v132_v34  ;;  %v319_v39 = vpop.f32.mrb[15].mxu0  ;;  %913 = vmatpush3.bf16.msra.mxu1 %v910_v31 }
  0xf5   :  { %v914_v40 = vpack.c.bf16 %v341_v33, %v340_v35  ;;  %v320_v41 = vadd.f32 %v319_v39, %v127_v37  ;;  %v390_v11 = vpop.permute.xlu0 %389  ;;  %v394_v26 = vpop.permute.xlu1 %393 }
  0xf6   :  { %v343_v42 = vmax.f32 %v325_v38, 0.0 }
  0xf7   :  { %v342_v43 = vmax.f32 %v320_v41, 0.0  ;;  %915 = vmatprep.subr.bf16.mxu1 %v914_v40 }
  0xf8   :  { %917 = vmatpush3.bf16.msra.mxu1 %v914_v40 }
  0xf9   :  { %v918_v44 = vpack.c.bf16 %v343_v42, %v342_v43  ;;  %v398_v23 = vpop.permute.xlu0 %397  ;;  %v402_v38 = vpop.permute.xlu1 %401 }
  0xfb   :  { %919 = vmatprep.subr.bf16.mxu1 %v918_v44 }
  0xfc   :  { %921 = vmatpush3.bf16.msra.mxu1 %v918_v44 }
  0xfd   :  { %v406_v35 = vpop.permute.xlu0 %405 }
  0xff   :  { %832 = vmatmul.mubr.f32.vlgmr.msra.gmra.mrb[0].mxu1 %v345_v45 }
 0x100   :  { %834 = vmatprep.mubr.f32.mxu1 %v346_v46 }
 0x103   :  { %835 = vmatmul.mubr.f32.gmra.mrb[2].mxu1 %v347_v47 }
 0x104   :  { %837 = vmatprep.mubr.f32.mxu1 %v348_v48  ;;  %v414_v48 = vpop.permute.xlu0 %413 }
 0x107   :  { %838 = vmatmul.mubr.f32.gmra.mrb[4].mxu1 %v349_v49 }
 0x108   :  { %840 = vmatprep.mubr.f32.mxu1 %v350_v50  ;;  %v422_v61 = vpop.permute.xlu0 %421 }
 0x10b   :  { %841 = vmatmul.mubr.f32.gmra.mrb[6].mxu1 %v351_v51  ;;  %v410_v51 = vpop.permute.xlu1 %409 }
 0x10c   :  { %843 = vmatprep.mubr.f32.mxu1 %v352_v52 }
 0x10f   :  { %844 = vmatmul.mubr.f32.gmra.mrb[8].mxu1 %v353_v53 }
 0x110   :  { %846 = vmatprep.mubr.f32.mxu1 %v354_v54 }
 0x113   :  { %847 = vmatmul.mubr.f32.gmra.mrb[10].mxu1 %v355_v55 }
 0x114   :  { %849 = vmatprep.mubr.f32.mxu1 %v356_v56 }
 0x117   :  { %850 = vmatmul.mubr.f32.gmra.mrb[12].mxu1 %v357_v57 }
 0x118   :  { %852 = vmatprep.mubr.f32.mxu1 %v358_v58 }
 0x11b   :  { %853 = vmatmul.mubr.f32.gmra.mrb[14].mxu1 %v359_v59 }
 0x1d2   :  { %v833_v5 = vpop.f32.mrb[0].mxu1 }
 0x1d3   :  { %v496_v6 = vadd.f32 %v833_v5, %v366_v0  ;;  %v490_v8 = vpop.f32.mrb[1].mxu1  ;;  %v418_v0 = vpop.permute.xlu1 %417 }
 0x1d4   :  { %v491_v9 = vadd.f32 %v490_v8, %v362_v63 }
 0x1d5   :  { %v570_v10 = vmax.f32 %v496_v6, 0.0 }
 0x1d6   :  { %v569_v12 = vmax.f32 %v491_v9, 0.0  ;;  %v836_v13 = vpop.f32.mrb[2].mxu1  ;;  %v585_v9 = vld [vmem:[%s1220_s3] sm:$0xff]  ;;  %s965_s3 = scalar_lea.vmem %s683_s10, 128 }
 0x1d7   :  { %v506_v15 = vadd.f32 %v836_v13, %v374_v1  ;;  %v500_v16 = vpop.f32.mrb[3].mxu1  ;;  %p966_p0 = scmp.ne.s32.totalorder %s683_s10, %s965_s3  ;;  %p971_p2 = scmp.lt.s32.totalorder %s965_s3, %s965_s3 }
 0x1d8   :  { %v923_v17 = vpack.c.bf16 %v570_v10, %v569_v12  ;;  %v501_v18 = vadd.f32 %v500_v16, %v370_v2  ;;  %v588_v10 = vpop.permute.xlu1 %587 }
 0x1d9   :  { %v572_v7 = vmax.f32 %v506_v15, 0.0  ;;  %p972_p3 = por %p971_p2, %p970_p1 }
 0x1da   :  { %v571_v19 = vmax.f32 %v501_v18, 0.0  ;;  %v839_v20 = vpop.f32.mrb[4].mxu1  ;;  %924 = vmatpush3.bf16.msra.mxu0 %v923_v17 }
 0x1db   :  { %v516_v21 = vadd.f32 %v839_v20, %v382_v3  ;;  %v510_v22 = vpop.f32.mrb[5].mxu1  ;;  %925 = vmatprep.subr.bf16.mxu0 %v991_v60  ;;  %p973_p4 = pnand %p972_p3, %p966_p0 }
 0x1dc   :  { %v926_v24 = vpack.c.bf16 %v572_v7, %v571_v19  ;;  %v511_v25 = vadd.f32 %v510_v22, %v378_v4 }
 0x1dd   :  { %v574_v27 = vmax.f32 %v516_v21, 0.0 }
 0x1de   :  { %v573_v28 = vmax.f32 %v511_v25, 0.0  ;;  %v842_v29 = vpop.f32.mrb[6].mxu1  ;;  %927 = vmatpush3.bf16.msra.mxu0 %v926_v24 }
 0x1df   :  { %v526_v30 = vadd.f32 %v842_v29, %v390_v11  ;;  %v520_v31 = vpop.f32.mrb[7].mxu1  ;;  %928 = vmatprep.subr.bf16.mxu0 %v991_v60 }
 0x1e0   :  { %v929_v32 = vpack.c.bf16 %v574_v27, %v573_v28  ;;  %v521_v33 = vadd.f32 %v520_v31, %v386_v14 }
 0x1e1   :  { %v576_v34 = vmax.f32 %v526_v30, 0.0 }
 0x1e2   :  { %v575_v36 = vmax.f32 %v521_v33, 0.0  ;;  %v845_v37 = vpop.f32.mrb[8].mxu1  ;;  %930 = vmatpush3.bf16.msra.mxu0 %v929_v32 }
 0x1e3   :  { %v536_v39 = vadd.f32 %v845_v37, %v398_v23  ;;  %v530_v40 = vpop.f32.mrb[9].mxu1  ;;  %931 = vmatprep.subr.bf16.mxu0 %v991_v60 }
 0x1e4   :  { %v932_v41 = vpack.c.bf16 %v576_v34, %v575_v36  ;;  %v531_v42 = vadd.f32 %v530_v40, %v394_v26 }
 0x1e5   :  { %v578_v43 = vmax.f32 %v536_v39, 0.0 }
 0x1e6   :  { %v577_v44 = vmax.f32 %v531_v42, 0.0  ;;  %v848_v45 = vpop.f32.mrb[10].mxu1  ;;  %933 = vmatpush3.bf16.msra.mxu0 %v932_v41 }
 0x1e7   :  { %v546_v46 = vadd.f32 %v848_v45, %v406_v35  ;;  %v540_v47 = vpop.f32.mrb[11].mxu1  ;;  %934 = vmatprep.subr.bf16.mxu0 %v991_v60 }
 0x1e8   :  { %v935_v49 = vpack.c.bf16 %v578_v43, %v577_v44  ;;  %v541_v50 = vadd.f32 %v540_v47, %v402_v38 }
 0x1e9   :  { %v580_v52 = vmax.f32 %v546_v46, 0.0 }
 0x1ea   :  { %v579_v53 = vmax.f32 %v541_v50, 0.0  ;;  %v851_v54 = vpop.f32.mrb[12].mxu1  ;;  %936 = vmatpush3.bf16.msra.mxu0 %v935_v49 }
 0x1eb   :  { %v556_v55 = vadd.f32 %v851_v54, %v414_v48  ;;  %v550_v56 = vpop.f32.mrb[13].mxu1  ;;  %937 = vmatprep.subr.bf16.mxu0 %v991_v60 }
 0x1ec   :  { %v938_v57 = vpack.c.bf16 %v580_v52, %v579_v53  ;;  %v551_v58 = vadd.f32 %v550_v56, %v410_v51 }
 0x1ed   :  { %v582_v59 = vmax.f32 %v556_v55, 0.0 }
 0x1ee   :  { %v581_v62 = vmax.f32 %v551_v58, 0.0  ;;  %v854_v63 = vpop.f32.mrb[14].mxu1  ;;  %939 = vmatpush3.bf16.msra.mxu0 %v938_v57 }
 0x1ef   :  { %v566_v1 = vadd.f32 %v854_v63, %v422_v61  ;;  %v560_v2 = vpop.f32.mrb[15].mxu1  ;;  %940 = vmatprep.subr.bf16.mxu0 %v991_v60 }
 0x1f0   :  { %v941_v3 = vpack.c.bf16 %v582_v59, %v581_v62  ;;  %v561_v4 = vadd.f32 %v560_v2, %v418_v0 }
 0x1f1   :  { %v584_v5 = vmax.f32 %v566_v1, 0.0 }
 0x1f2   :  { %v583_v6 = vmax.f32 %v561_v4, 0.0  ;;  %942 = vmatpush3.bf16.msra.mxu0 %v941_v3 }
 0x1f3   :  { %943 = vmatprep.subr.bf16.mxu0 %v991_v60  ;;  %v660_v60 = vlaneseq }
 0x1f4   :  { %v944_v8 = vpack.c.bf16 %v584_v5, %v583_v6 }
 0x1f5   :  { %v661_v19 = vshrl.u32 %v660_v60, 7 }
 0x1f6   :  { %945 = vmatpush3.bf16.msra.mxu0 %v944_v8 }
 0x1f7   :  { %vm673_vm2 = vcmp.eq.s32.totalorder %v661_v19, 0 }
 0x1f9   :  { %888 = vmatmul.mubr.f32.vlgmr.msra.gmra.mrb[16].mxu0 %v585_v9 }
 0x2cc   :  { %v656_v11 = vpop.f32.mrb[16].mxu0 }
 0x2cd   :  { %v657_v12 = vadd.f32 %v656_v11, %v588_v10  ;;  %v889_v13 = vpop.f32.mrb[17].mxu0 }
 0x2cf   :  { %v706_v14 = vmul.f32 -1.442695, %v657_v12  ;;  %v669_v15 = vmax.f32 %v657_v12, -20.0 }
 0x2d1   :  { %959 = vpow2.f32 %v706_v14  ;;  %v670_v16 = vmin.f32 %v669_v15, 2.0 }
 0x2d3   :  { %v671_v7 = vmul.f32 1.442695, %v670_v16 }
 0x2db   :  { %v960_v17 = vpop.eup %959 }
 0x2dc   :  { %v665_v18 = vadd.f32 1.0, %v960_v17 }
 0x2de   :  { %961 = vrcp.f32 %v665_v18 }
 0x2df   :  { %963 = vpow2.f32 %v671_v7 }
 0x2e8   :  { %v962_v20 = vpop.eup %961 }
 0x2e9   :  { %v668_v21 = vmul.f32 2.0, %v962_v20  ;;  %v964_v22 = vpop.eup %963 }
 0x2eb   :  { %v674_v23 = vsel %vm673_vm2, %v668_v21, %v964_v22 }
 0x2ec   :  { %675 = vst [vmem:[#allocation2] sm:$0xff] %v674_v23 }
 0x2ed   :  { %976 = shalt.err (!%p973_p4)
}
 0x2ee   :  { %s977_s13 = scalar_lea.hbm %s1222_s5, 128 }
 0x2ef   :  { %p978_p5 = scmp.ne.s32.totalorder %s1222_s5, %s977_s13  ;;  %p981_p6 = scmp.lt.u32.totalorder %s977_s13, %s1222_s5 }
 0x2f1   :  { %p983_p7 = pnand %p981_p6, %p978_p5 }
 0x2f3   :  { %986 = shalt.err (!%p983_p7)
}
 0x2f4   :  { %685 = dma.vmem_to_hbm [thread:$0]  %s683_s10, 128, %s1222_s5, [#allocation3]  }
 0x2f5   :  { %987 = dma.done.wait [#allocation3], 128  }
 0x2f6   :  { %988 = vsyncadd [#allocation3], 4294967168 }
 0x2f7   :  { %689 = vsyncpa [#allocation3], 1 }

</bundles_post_ra>
